<compile_context>
chip_gen: v6e
topology: v6e:2x2x1
jax: 0.10.0
libtpu: 0.0.40
codegen_flags: <defaults>
</compile_context>

<pallas_src>
import jax
import jax.numpy as jnp
from jax.experimental import pallas as pl
from jax.experimental.pallas import tpu as pltpu

HIDDEN_SIZE = 3


def mlp_kernel(w1_ref, b1_ref, w2_ref, b2_ref, x_ref, o_ref):
    # w1_ref, b1_ref, w2_ref: (H,) f32 in SMEM   (scalar weights)
    # b2_ref:                 (1,) f32 in SMEM
    # x_ref, o_ref:           (tile_rows, lanes) f32 in VMEM (batch packed on lanes)
    x = x_ref[...]                                    # (tile_rows, lanes)
    hidden_size = w1_ref.shape[0]                     # static
    acc = jnp.zeros(x.shape, jnp.float32)
    # Fully unrolled H-term FMA chain: pure VPU work, lane-dense.
    for h in range(hidden_size):
        hh = jnp.maximum(x * w1_ref[h] + b1_ref[h], 0.0)   # ReLU(hidden1)
        acc = acc + hh * w2_ref[h]                          # hidden4 accumulate
    o_ref[...] = (acc + b2_ref[0]).astype(o_ref.dtype)


def _choose_tile(batch, lanes=512, tile_rows=256):
    """Shrink the (tile_rows, lanes) tile for small batches so padding stays sane,
    while keeping lanes a multiple of 128 and tile_rows a multiple of 8."""
    while lanes > 128 and (lanes // 2) * 8 >= batch:
        lanes //= 2
    while tile_rows > 8 and (tile_rows // 2) * lanes >= batch:
        tile_rows //= 2
    return tile_rows, lanes


def net_forward(x, w1, b1, w2, b2):
    """x: (B, 1) float32. w1/b1/w2: (H,), b2: (1,). Returns (B, 1) float32."""
    B = x.shape[0]
    x_flat = x.reshape(-1).astype(jnp.float32)

    tile_rows, lanes = _choose_tile(B)
    rows = -(-B // lanes)                          # ceil(B / lanes)
    rows_padded = -(-rows // tile_rows) * tile_rows
    total = rows_padded * lanes

    # Pad and pack the batch onto lanes: (rows_padded, lanes) slab, row-major.
    x_slab = jnp.pad(x_flat, (0, total - B)).reshape(rows_padded, lanes)

    grid = (rows_padded // tile_rows,)
    smem_spec = pl.BlockSpec(memory_space=pltpu.MemorySpace.SMEM)

    out_slab = pl.pallas_call(
        mlp_kernel,
        out_shape=jax.ShapeDtypeStruct((rows_padded, lanes), jnp.float32),
        grid=grid,
        in_specs=[
            smem_spec,                                           # w1 (H,)
            smem_spec,                                           # b1 (H,)
            smem_spec,                                           # w2 (H,)
            smem_spec,                                           # b2 (1,)
            pl.BlockSpec((tile_rows, lanes), lambda i: (i, 0)),  # x slab tile
        ],
        out_specs=pl.BlockSpec((tile_rows, lanes), lambda i: (i, 0)),
        compiler_params=pltpu.CompilerParams(
            dimension_semantics=("parallel",)),
    )(w1.reshape(-1), b1.reshape(-1), w2.reshape(-1), b2.reshape(-1), x_slab)

    # Drop padding, restore (B, 1) layout of nn.Linear output.
    return out_slab.reshape(-1)[:B].reshape(B, 1)


def init_params(key, hidden_size):
    """Deterministic init mimicking nn.Linear (uniform +/- 1/sqrt(fan_in)).

    PyTorch mapping: hidden1.weight (H,1) -> w1 (H,), hidden1.bias (H,) -> b1 (H,),
                     hidden4.weight (1,H) -> w2 (H,), hidden4.bias (1,) -> b2 (1,).
    """
    k1, k2, k3, k4 = jax.random.split(key, 4)
    bound1 = 1.0  # 1/sqrt(1)
    w1 = jax.random.uniform(k1, (hidden_size,), jnp.float32, -bound1, bound1)
    b1 = jax.random.uniform(k2, (hidden_size,), jnp.float32, -bound1, bound1)
    bound2 = 1.0 / jnp.sqrt(float(hidden_size))
    w2 = jax.random.uniform(k3, (hidden_size,), jnp.float32, -bound2, bound2)
    b2 = jax.random.uniform(k4, (1,), jnp.float32, -bound2, bound2)
    return w1, b1, w2, b2


def _reference(x, w1, b1, w2, b2):
    # Pure-JAX reference: relu(x @ W1 + b1) @ W2 + b2 with (in, out) weight layout.
    h = jnp.maximum(x @ w1[None, :] + b1[None, :], 0.0)   # (B, H)
    return h @ w2[:, None] + b2[0]                          # (B, 1)


if __name__ == "__main__":
    key = jax.random.PRNGKey(0)
    k_x, k_p, k_x2 = jax.random.split(key, 3)

    w1, b1, w2, b2 = init_params(k_p, HIDDEN_SIZE)

    # Small batch (heavily padded path).
    batch = 8
    x = jax.random.normal(k_x, (batch, 1), jnp.float32)
    out = jax.block_until_ready(net_forward(x, w1, b1, w2, b2))
    ref = _reference(x, w1, b1, w2, b2)
    assert out.shape == (batch, 1)
    assert jnp.allclose(out, ref, atol=1e-5, rtol=1e-5)

    # Non-multiple-of-tile batch (exercises padding + tail slicing).
    batch2 = 523
    x2 = jax.random.normal(k_x2, (batch2, 1), jnp.float32)
    out2 = jax.block_until_ready(net_forward(x2, w1, b1, w2, b2))
    ref2 = _reference(x2, w1, b1, w2, b2)
    assert out2.shape == (batch2, 1)
    assert jnp.allclose(out2, ref2, atol=1e-5, rtol=1e-5)

    print("KERNEL_OK")
</pallas_src>

<mosaic_0001>
module attributes {stable_mosaic.version = 11 : i64} {
  func.func @mlp_kernel(%arg0: i32, %arg1: memref<3xf32, #tpu.memory_space<smem>>, %arg2: memref<3xf32, #tpu.memory_space<smem>>, %arg3: memref<3xf32, #tpu.memory_space<smem>>, %arg4: memref<1xf32, #tpu.memory_space<smem>>, %arg5: memref<8x128xf32, #tpu.memory_space<vmem>>, %arg6: memref<8x128xf32, #tpu.memory_space<vmem>>) attributes {dimension_semantics = [#tpu.dimension_semantics<parallel>], iteration_bounds = array<i64: 1>, scalar_prefetch = 0 : i64, scratch_operands = 0 : i64, tpu.core_type = #tpu.core_type<tc>, window_params = [{transform_indices = @transform_0, window_bounds = array<i64: 3>}, {transform_indices = @transform_1, window_bounds = array<i64: 3>}, {transform_indices = @transform_2, window_bounds = array<i64: 3>}, {transform_indices = @transform_3, window_bounds = array<i64: 1>}, {transform_indices = @transform_4, window_bounds = array<i64: 8, 128>}, {transform_indices = @transform_5, window_bounds = array<i64: 8, 128>}]} {
    %c0 = arith.constant 0 : index
    %c0_0 = arith.constant 0 : index
    %0 = vector.load %arg5[%c0, %c0_0] : memref<8x128xf32, #tpu.memory_space<vmem>>, vector<8x128xf32>
    %cst = arith.constant 0.000000e+00 : f32
    %1 = vector.broadcast %cst : f32 to vector<8x128xf32>
    %c0_1 = arith.constant 0 : index
    %2 = memref.load %arg1[%c0_1] : memref<3xf32, #tpu.memory_space<smem>>
    %3 = vector.broadcast %2 : f32 to vector<8x128xf32>
    %4 = arith.mulf %0, %3 : vector<8x128xf32>
    %c0_2 = arith.constant 0 : index
    %5 = memref.load %arg2[%c0_2] : memref<3xf32, #tpu.memory_space<smem>>
    %6 = vector.broadcast %5 : f32 to vector<8x128xf32>
    %7 = arith.addf %4, %6 : vector<8x128xf32>
    %cst_3 = arith.constant 0.000000e+00 : f32
    %8 = vector.broadcast %cst_3 : f32 to vector<8x128xf32>
    %9 = arith.maximumf %7, %8 : vector<8x128xf32>
    %c0_4 = arith.constant 0 : index
    %10 = memref.load %arg3[%c0_4] : memref<3xf32, #tpu.memory_space<smem>>
    %11 = vector.broadcast %10 : f32 to vector<8x128xf32>
    %12 = arith.mulf %9, %11 : vector<8x128xf32>
    %13 = arith.addf %1, %12 : vector<8x128xf32>
    %c1 = arith.constant 1 : index
    %14 = memref.load %arg1[%c1] : memref<3xf32, #tpu.memory_space<smem>>
    %15 = vector.broadcast %14 : f32 to vector<8x128xf32>
    %16 = arith.mulf %0, %15 : vector<8x128xf32>
    %c1_5 = arith.constant 1 : index
    %17 = memref.load %arg2[%c1_5] : memref<3xf32, #tpu.memory_space<smem>>
    %18 = vector.broadcast %17 : f32 to vector<8x128xf32>
    %19 = arith.addf %16, %18 : vector<8x128xf32>
    %cst_6 = arith.constant 0.000000e+00 : f32
    %20 = vector.broadcast %cst_6 : f32 to vector<8x128xf32>
    %21 = arith.maximumf %19, %20 : vector<8x128xf32>
    %c1_7 = arith.constant 1 : index
    %22 = memref.load %arg3[%c1_7] : memref<3xf32, #tpu.memory_space<smem>>
    %23 = vector.broadcast %22 : f32 to vector<8x128xf32>
    %24 = arith.mulf %21, %23 : vector<8x128xf32>
    %25 = arith.addf %13, %24 : vector<8x128xf32>
    %c2 = arith.constant 2 : index
    %26 = memref.load %arg1[%c2] : memref<3xf32, #tpu.memory_space<smem>>
    %27 = vector.broadcast %26 : f32 to vector<8x128xf32>
    %28 = arith.mulf %0, %27 : vector<8x128xf32>
    %c2_8 = arith.constant 2 : index
    %29 = memref.load %arg2[%c2_8] : memref<3xf32, #tpu.memory_space<smem>>
    %30 = vector.broadcast %29 : f32 to vector<8x128xf32>
    %31 = arith.addf %28, %30 : vector<8x128xf32>
    %cst_9 = arith.constant 0.000000e+00 : f32
    %32 = vector.broadcast %cst_9 : f32 to vector<8x128xf32>
    %33 = arith.maximumf %31, %32 : vector<8x128xf32>
    %c2_10 = arith.constant 2 : index
    %34 = memref.load %arg3[%c2_10] : memref<3xf32, #tpu.memory_space<smem>>
    %35 = vector.broadcast %34 : f32 to vector<8x128xf32>
    %36 = arith.mulf %33, %35 : vector<8x128xf32>
    %37 = arith.addf %25, %36 : vector<8x128xf32>
    %c0_11 = arith.constant 0 : index
    %38 = memref.load %arg4[%c0_11] : memref<1xf32, #tpu.memory_space<smem>>
    %39 = vector.broadcast %38 : f32 to vector<8x128xf32>
    %40 = arith.addf %37, %39 : vector<8x128xf32>
    %c0_12 = arith.constant 0 : index
    %c0_13 = arith.constant 0 : index
    %41 = vector.load %arg6[%c0_12, %c0_13] : memref<8x128xf32, #tpu.memory_space<vmem>>, vector<8x128xf32>
    tpu.vector_store %arg6[%c0_12, %c0_13], %40 {strides = array<i32>} : memref<8x128xf32, #tpu.memory_space<vmem>>, vector<8x128xf32>,
    return
  }
  func.func @transform_0(%arg0: i32) -> i32 {
    %c0_i32 = arith.constant 0 : i32
    %c0_i32_0 = arith.constant 0 : i32
    return %c0_i32 : i32
  }
  func.func @transform_1(%arg0: i32) -> i32 {
    %c0_i32 = arith.constant 0 : i32
    %c0_i32_0 = arith.constant 0 : i32
    return %c0_i32 : i32
  }
  func.func @transform_2(%arg0: i32) -> i32 {
    %c0_i32 = arith.constant 0 : i32
    %c0_i32_0 = arith.constant 0 : i32
    return %c0_i32 : i32
  }
  func.func @transform_3(%arg0: i32) -> i32 {
    %c0_i32 = arith.constant 0 : i32
    %c0_i32_0 = arith.constant 0 : i32
    return %c0_i32 : i32
  }
  func.func @transform_4(%arg0: i32) -> (i32, i32) {
    %c0_i32 = arith.constant 0 : i32
    %c0_i32_0 = arith.constant 0 : i32
    return %arg0, %c0_i32 : i32, i32
  }
  func.func @transform_5(%arg0: i32) -> (i32, i32) {
    %c0_i32 = arith.constant 0 : i32
    %c0_i32_0 = arith.constant 0 : i32
    return %arg0, %c0_i32 : i32, i32
  }
}

</mosaic_0001>

<bundles_post_ra>
// kernel: tpu_custom_call.1
= control target key start
LH: loop header
LB: loop body
LE: loop exit
PB: predicated region body
PF: predicated region fallthrough
CT: control target
= control target key end

     0   :  { %11 = vsyncpa [#allocation6], 0  ;;  %s273_s0 = inlined_call_operand.vmem [shape: f32[3], index: 0, kind: input, shape index: {}]   ;;  %s274_s1 = inlined_call_operand.vmem [shape: f32[3], index: 1, kind: input, shape index: {}]   ;;  %s275_s2 = inlined_call_operand.vmem [shape: f32[3], index: 2, kind: input, shape index: {}]   ;;  %s276_s3 = inlined_call_operand.<no memory space> [shape: f32[1], index: 3, kind: input, shape index: {}]   ;;  %s277_s4 = inlined_call_operand.hbm [shape: f32[8,128], index: 4, kind: input, shape index: {}]   ;;  %s278_s5 = inlined_call_operand.hbm [shape: f32[8,128], index: 5, kind: output, shape index: {}]  }
   0x1   :  { %12 = vsyncpa [#allocation8], 0 }
   0x2   :  { %13 = vsyncpa [#allocation4], 0  ;;  %s31_s20 = sshll.u32 %s274_s1, 4  ;;  %s32_s20 = int_to_ptr.vmem [resolvable:$true] %s31_s20 }
   0x3   :  { %14 = vsyncpa [#allocation5], 0  ;;  %s21_s23 = sshll.u32 %s273_s0, 4  ;;  %s136_s24 = scalar_lea.vmem %s32_s20, 16  ;;  %s22_s23 = int_to_ptr.vmem [resolvable:$true] %s21_s23 }
   0x4   :  { %p137_p0 = scmp.ne.s32.totalorder %s32_s20, %s136_s24  ;;  %p141_p1 = scmp.lt.s32.totalorder %s32_s20, %s32_s20 }
   0x5   :  { %p142_p2 = scmp.lt.s32.totalorder %s136_s24, %s136_s24 }
   0x7   :  { %p143_p3 = por %p142_p2, %p141_p1 }
   0x9   :  { %p144_p4 = pnand %p143_p3, %p137_p0 }
   0xb   :  { %147 = shalt.err (!%p144_p4)
}
   0xc   :  { %s220_s25 = smov [#allocation7]   ;;  %s148_s26 = scalar_lea.vmem %s22_s23, 16 }
   0xd   :  { %34 = dma.vmem_to_smem %s32_s20, 16, %s220_s25, [#allocation8]  }
   0xe   :  { %p149_p5 = scmp.ne.s32.totalorder %s22_s23, %s148_s26  ;;  %p153_p6 = scmp.lt.s32.totalorder %s22_s23, %s22_s23 }
   0xf   :  { %p154_p7 = scmp.lt.s32.totalorder %s148_s26, %s148_s26 }
  0x11   :  { %p155_p8 = por %p154_p7, %p153_p6 }
  0x13   :  { %p156_p9 = pnand %p155_p8, %p149_p5 }
  0x15   :  { %159 = shalt.err (!%p156_p9)
}
  0x16   :  { %s221_s1 = smov [#allocation3]   ;;  %s41_s28 = sshll.u32 %s275_s2, 4  ;;  %s42_s28 = int_to_ptr.vmem [resolvable:$true] %s41_s28 }
  0x17   :  { %24 = dma.vmem_to_smem %s22_s23, 16, %s221_s1, [#allocation6]  }
  0x18   :  { %s160_s29 = scalar_lea.vmem %s42_s28, 16  ;;  %p165_p11 = scmp.lt.s32.totalorder %s42_s28, %s42_s28 }
  0x19   :  { %p161_p10 = scmp.ne.s32.totalorder %s42_s28, %s160_s29  ;;  %p166_p12 = scmp.lt.s32.totalorder %s160_s29, %s160_s29 }
  0x1b   :  { %p167_p13 = por %p166_p12, %p165_p11 }
  0x1d   :  { %p168_p0 = pnand %p167_p13, %p161_p10 }
  0x1f   :  { %171 = shalt.err (!%p168_p0)
}
  0x20   :  { %s222_s30 = smov [#allocation9]   ;;  %s223_s6 = smov [#allocation10]  }
  0x21   :  { %44 = dma.vmem_to_smem %s42_s28, 16, %s222_s30, [#allocation8]  }
  0x22   :  { %s53_s7 = sshll.u32 %s223_s6, 4  ;;  %s54_s7 = int_to_ptr.vmem [resolvable:$true] %s53_s7 }
  0x23   :  { %s180_s8 = scalar_lea.vmem %s54_s7, 128  ;;  %p185_p2 = scmp.lt.s32.totalorder %s54_s7, %s54_s7 }
  0x24   :  { %p181_p1 = scmp.ne.s32.totalorder %s54_s7, %s180_s8  ;;  %p186_p3 = scmp.lt.s32.totalorder %s180_s8, %s180_s8 }
  0x26   :  { %p187_p4 = por %p186_p3, %p185_p2 }
  0x28   :  { %p188_p5 = pnand %p187_p4, %p181_p1 }
  0x2a   :  { %191 = shalt.err (!%p188_p5)
}
  0x2b   :  { %56 = dma.hbm_to_vmem [thread:$0]  %s277_s4, 128, %s54_s7, [#allocation4]  }
  0x2c   :  { %212 = dma.done.wait [#allocation6], 16  }
  0x2d   :  { %213 = vsyncadd [#allocation6], 4294967280 }
  0x2e   :  { %214 = dma.done.wait [#allocation8], 32  }
  0x2f   :  { %215 = vsyncadd [#allocation8], 4294967264 }
  0x30   :  { %216 = dma.done.wait [#allocation4], 128  }
  0x31   :  { %217 = vsyncadd [#allocation4], 4294967168 }
  0x32   :  { %69 = sfence }
  0x33   :  { %s71_s10 = sld [smem:[#allocation3]]  ;;  %v70_v0 = vld [vmem:[#allocation10] sm:$0xff]  ;;  %v105_v23 = vstv %s276_s3  ;;  %s224_s20 = smov [#allocation11]  }
  0x34   :  { %s74_s11 = sld [smem:[#allocation7]]  ;;  %s114_s21 = sshll.u32 %s224_s20, 4  ;;  %s115_s21 = int_to_ptr.vmem [resolvable:$true] %s114_s21 }
  0x35   :  { %s78_s12 = sld [smem:[#allocation9]]  ;;  %s192_s22 = scalar_lea.vmem %s115_s21, 128 }
  0x36   :  { %s125_s13 = sld [smem:[#allocation3 + $0x1]]  ;;  %p193_p6 = scmp.ne.s32.totalorder %s115_s21, %s192_s22 }
  0x37   :  { %s126_s14 = sld [smem:[#allocation7 + $0x1]]  ;;  %p197_p7 = scmp.lt.s32.totalorder %s115_s21, %s115_s21 }
  0x38   :  { %s127_s15 = sld [smem:[#allocation9 + $0x1]]  ;;  %p198_p8 = scmp.lt.s32.totalorder %s192_s22, %s192_s22 }
  0x39   :  { %v72_v1 = vstv %s71_s10  ;;  %s128_s16 = sld [smem:[#allocation3 + $0x2]] }
  0x3a   :  { %v73_v2 = vmul.f32 %v72_v1, %v70_v0  ;;  %v75_v3 = vstv %s74_s11  ;;  %s129_s17 = sld [smem:[#allocation7 + $0x2]]  ;;  %p199_p9 = por %p198_p8, %p197_p7 }
  0x3b   :  { %s130_s4 = sld [smem:[#allocation9 + $0x2]]  ;;  %v79_v9 = vstv %s78_s12 }
  0x3c   :  { %v76_v4 = vadd.f32 %v75_v3, %v73_v2  ;;  %v83_v5 = vstv %s125_s13  ;;  %p200_p10 = pnand %p199_p9, %p193_p6 }
  0x3d   :  { %v84_v6 = vmul.f32 %v83_v5, %v70_v0  ;;  %v86_v7 = vstv %s126_s14 }
  0x3e   :  { %v77_v8 = vmax.f32 %v76_v4, 0.0  ;;  %v90_v12 = vstv %s127_s15 }
  0x3f   :  { %v87_v10 = vadd.f32 %v86_v7, %v84_v6  ;;  %v94_v11 = vstv %s128_s16 }
  0x40   :  { %v95_v13 = vmul.f32 %v94_v11, %v70_v0  ;;  %v97_v14 = vstv %s129_s17  ;;  %v80_v15 = vmul.f32 %v79_v9, %v77_v8 }
  0x41   :  { %v88_v16 = vmax.f32 %v87_v10, 0.0  ;;  %v101_v19 = vstv %s130_s4 }
  0x42   :  { %v98_v17 = vadd.f32 %v97_v14, %v95_v13 }
  0x43   :  { %v91_v18 = vmul.f32 %v90_v12, %v88_v16 }
  0x44   :  { %v99_v20 = vmax.f32 %v98_v17, 0.0 }
  0x45   :  { %v92_v21 = vadd.f32 %v91_v18, %v80_v15 }
  0x46   :  { %v102_v22 = vmul.f32 %v101_v19, %v99_v20 }
  0x48   :  { %v103_v24 = vadd.f32 %v102_v22, %v92_v21 }
  0x4a   :  { %v106_v25 = vadd.f32 %v105_v23, %v103_v24 }
  0x4c   :  { %107 = vst [vmem:[#allocation11] sm:$0xff] %v106_v25 }
  0x4d   :  { %203 = shalt.err (!%p200_p10)
}
  0x4e   :  { %117 = dma.vmem_to_hbm [thread:$0]  %s115_s21, 128, %s278_s5, [#allocation5]  }
  0x4f   :  { %218 = dma.done.wait [#allocation5], 128  }
  0x50   :  { %219 = vsyncadd [#allocation5], 4294967168 }
  0x51   :  { %121 = vsyncpa [#allocation4], 1 }
  0x52   :  { %122 = vsyncpa [#allocation5], 1 }
  0x53   :  { %123 = vsyncpa [#allocation6], 1 }
  0x54   :  { %124 = vsyncpa [#allocation8], 1 }

</bundles_post_ra>
